<compile_context>
chip_gen: v6e
topology: v6e:2x2x1
jax: 0.10.0
libtpu: 0.0.40
codegen_flags: <defaults>
</compile_context>

<pallas_src>
import functools

import jax
import jax.numpy as jnp
from jax.experimental import pallas as pl
from jax.experimental.pallas import tpu as pltpu


def _round_up(x, m):
    return ((x + m - 1) // m) * m


def _mixed_loss_kernel(logits_ref, targets_ref, out_ref, acc_ref, *,
                       n_total, gamma, mix_ratio, conf_coef, off_coef):
    pid = pl.program_id(0)
    last = pl.num_programs(0) - 1

    @pl.when(pid == 0)
    def _init():
        acc_ref[...] = jnp.zeros_like(acc_ref)

    x = logits_ref[...].astype(jnp.float32)            # (tile_n, C)
    t = targets_ref[...]                               # (tile_n, 1) int32
    tn, c = x.shape

    # --- row-wise logsumexp (numerically stable); one exp per element ---
    m = jnp.max(x, axis=-1, keepdims=True)
    lse = jnp.log(jnp.sum(jnp.exp(x - m), axis=-1, keepdims=True)) + m  # (tn, 1)

    # target logit via one-hot select (no full logp materialization)
    cls_ids = jax.lax.broadcasted_iota(jnp.int32, (tn, c), 1)
    x_t = jnp.sum(jnp.where(cls_ids == t, x, 0.0), axis=-1, keepdims=True)
    sum_x = jnp.sum(x, axis=-1, keepdims=True)

    logp_t = x_t - lse                                  # (tn, 1)
    ce = -logp_t

    # --- focal weight (alpha=None path of F.cross_entropy) ---
    pt = jnp.exp(logp_t)
    base = jnp.maximum(1.0 - pt, 0.0)                   # clamp: pt may round above 1
    if float(gamma).is_integer():
        w = jnp.ones_like(base)
        for _ in range(int(round(gamma))):              # gamma=2 -> two VPU muls
            w = w * base
    else:
        w = jnp.power(base, gamma)                      # safe: base >= 0

    # --- fused focal + label-smoothing per-row term ---
    # sum_{j != t} logp_j = (sum_x - x_t) - (C-1)*lse
    off_mass = (sum_x - x_t) - (c - 1) * lse
    fused = (mix_ratio * w + conf_coef) * ce - off_coef * off_mass      # (tn, 1)

    # mask padded tail rows, accumulate per-row partial sums (VPU add only)
    row_ids = pid * tn + jax.lax.broadcasted_iota(jnp.int32, (tn, 1), 0)
    fused = jnp.where(row_ids < n_total, fused, 0.0)
    acc_ref[...] += fused

    # single cross-sublane reduction + scalar store, only on the last tile
    @pl.when(pid == last)
    def _finalize():
        out_ref[...] = jnp.sum(acc_ref[...], axis=0, keepdims=True) * (1.0 / n_total)


def mixed_loss(logits, targets, *, gamma=2.0, smoothing=0.1, mix_ratio=0.5,
               block_rows=512):
    """logits: [N, C] float (f32/bf16/...), targets: [N] int -> scalar f32."""
    n, c = logits.shape
    if n <= block_rows:
        tile_n = n                                      # full-dim block is always legal
    else:
        tile_n = _round_up(min(int(block_rows), n), 8)  # 8-aligned sublane tile
    grid = (pl.cdiv(n, tile_n),)
    targets2d = targets.reshape(n, 1).astype(jnp.int32)

    confidence = 1.0 - smoothing
    off_value = smoothing / (c - 1) if c > 1 else 0.0   # guard C == 1
    conf_coef = (1.0 - mix_ratio) * confidence          # compile-time constants
    off_coef = (1.0 - mix_ratio) * off_value

    # TODO(synk): alpha (per-class weight) path of the module is not implemented
    #             (module default alpha=None is what is reproduced here).
    # TODO(synk): for C << 128 a lane-dense layout (fold 128//C rows into lanes)
    #             and for vocab-scale C an online-logsumexp C-tiling would help;
    #             omitted to keep the lowering simple.
    kernel = functools.partial(
        _mixed_loss_kernel,
        n_total=int(n), gamma=float(gamma), mix_ratio=float(mix_ratio),
        conf_coef=float(conf_coef), off_coef=float(off_coef),
    )

    cost = pl.CostEstimate(
        flops=10 * n * c + 20 * n,
        transcendentals=n * c + 2 * n,
        bytes_accessed=n * c * logits.dtype.itemsize + n * 4 + 4,
    )

    out = pl.pallas_call(
        kernel,
        out_shape=jax.ShapeDtypeStruct((1, 1), jnp.float32),
        grid_spec=pltpu.PrefetchScalarGridSpec(
            num_scalar_prefetch=0,
            grid=grid,
            in_specs=[
                pl.BlockSpec((tile_n, c), lambda i: (i, 0)),
                pl.BlockSpec((tile_n, 1), lambda i: (i, 0)),
            ],
            out_specs=pl.BlockSpec((1, 1), lambda i: (0, 0)),
            scratch_shapes=[pltpu.VMEM((tile_n, 1), jnp.float32)],
        ),
        compiler_params=pltpu.CompilerParams(
            dimension_semantics=("arbitrary",),        # reduction over row tiles
            vmem_limit_bytes=32 * 1024 * 1024,
        ),
        cost_estimate=cost,
    )(logits, targets2d)
    return out[0, 0]


def _reference(logits, targets, *, gamma=2.0, smoothing=0.1, mix_ratio=0.5):
    # Pure-JAX reference mirroring the PyTorch module (alpha=None).
    logp = jax.nn.log_softmax(logits.astype(jnp.float32), axis=-1)
    n, c = logits.shape
    logp_t = jnp.take_along_axis(logp, targets[:, None], axis=-1)[:, 0]
    ce = -logp_t
    pt = jnp.exp(-ce)
    focal = jnp.mean((1.0 - pt) ** gamma * ce)
    confidence = 1.0 - smoothing
    true_dist = jnp.full((n, c), smoothing / (c - 1), jnp.float32)
    true_dist = true_dist.at[jnp.arange(n), targets].set(confidence)
    smooth = jnp.mean(jnp.sum(-true_dist * logp, axis=-1))
    return mix_ratio * focal + (1 - mix_ratio) * smooth


if __name__ == "__main__":
    key = jax.random.PRNGKey(0)
    k1, k2, k3, k4 = jax.random.split(key, 4)

    # Small case matching the module defaults: batch=16, classes=8.
    N, C = 16, 8
    logits = jax.random.normal(k1, (N, C), dtype=jnp.float32)
    targets = jax.random.randint(k2, (N,), 0, C, dtype=jnp.int32)
    loss = mixed_loss(logits, targets)
    jax.block_until_ready(loss)
    ref = _reference(logits, targets)
    assert jnp.allclose(loss, ref, atol=1e-5, rtol=1e-5), (loss, ref)

    # Multi-block case exercising the grid + tail-row masking (300 % 128 != 0).
    N2, C2 = 300, 10
    logits2 = jax.random.normal(k3, (N2, C2), dtype=jnp.float32)
    targets2 = jax.random.randint(k4, (N2,), 0, C2, dtype=jnp.int32)
    loss2 = mixed_loss(logits2, targets2, block_rows=128)
    jax.block_until_ready(loss2)
    ref2 = _reference(logits2, targets2)
    assert jnp.allclose(loss2, ref2, atol=1e-5, rtol=1e-5), (loss2, ref2)

    # Single-tile full-row block for a non-multiple-of-8 batch (tile_n == N == 300).
    loss2b = mixed_loss(logits2, targets2)
    jax.block_until_ready(loss2b)
    assert jnp.allclose(loss2b, ref2, atol=1e-5, rtol=1e-5), (loss2b, ref2)

    # bf16 inputs: half the HBM bytes streamed; compute stays f32 inside the kernel.
    loss3 = mixed_loss(logits.astype(jnp.bfloat16), targets)
    jax.block_until_ready(loss3)
    ref3 = _reference(logits.astype(jnp.bfloat16).astype(jnp.float32), targets)
    assert jnp.allclose(loss3, ref3, atol=1e-5, rtol=1e-5), (loss3, ref3)

    print("KERNEL_OK")
</pallas_src>

<mosaic_0001>
module attributes {stable_mosaic.version = 11 : i64} {
  func.func @_mixed_loss_kernel(%arg0: i32, %arg1: memref<16x8xf32, #tpu.memory_space<vmem>>, %arg2: memref<16x1xi32, #tpu.memory_space<vmem>>, %arg3: memref<1x1xf32, #tpu.memory_space<vmem>>, %arg4: memref<16x1xf32, #tpu.memory_space<vmem>>) attributes {dimension_semantics = [#tpu.dimension_semantics<arbitrary>], iteration_bounds = array<i64: 1>, scalar_prefetch = 0 : i64, scratch_operands = 1 : i64, tpu.core_type = #tpu.core_type<tc>, window_params = [{transform_indices = @transform_0, window_bounds = array<i64: 16, 8>}, {transform_indices = @transform_1, window_bounds = array<i64: 16, 1>}, {pipeline_mode = #tpu.pipeline_mode<synchronous>, transform_indices = @transform_2, window_bounds = array<i64: 1, 1>}]} {
    %c0_i32 = arith.constant 0 : i32
    %0 = arith.cmpi eq, %arg0, %c0_i32 : i32
    %1 = arith.extui %0 : i1 to i32
    %c0_i32_0 = arith.constant 0 : i32
    %2 = arith.cmpi ne, %1, %c0_i32_0 : i32
    scf.if %2 {
      %cst_24 = arith.constant 0.000000e+00 : f32
      %60 = vector.broadcast %cst_24 : f32 to vector<16x1xf32>
      %c0_25 = arith.constant 0 : index
      %c0_26 = arith.constant 0 : index
      %61 = vector.load %arg4[%c0_25, %c0_26] : memref<16x1xf32, #tpu.memory_space<vmem>>, vector<16x1xf32>
      tpu.vector_store %arg4[%c0_25, %c0_26], %60 {strides = array<i32>} : memref<16x1xf32, #tpu.memory_space<vmem>>, vector<16x1xf32>,
    } else {
    }
    %c0 = arith.constant 0 : index
    %c0_1 = arith.constant 0 : index
    %3 = vector.load %arg1[%c0, %c0_1] : memref<16x8xf32, #tpu.memory_space<vmem>>, vector<16x8xf32>
    %c0_2 = arith.constant 0 : index
    %c0_3 = arith.constant 0 : index
    %4 = vector.load %arg2[%c0_2, %c0_3] : memref<16x1xi32, #tpu.memory_space<vmem>>, vector<16x1xi32>
    %cst = arith.constant dense<0xFF800000> : vector<16xf32>
    %5 = vector.multi_reduction <maximumf>, %3, %cst [1] : vector<16x8xf32> to vector<16xf32>
    %6 = vector.shape_cast %5 : vector<16xf32> to vector<16x1xf32>
    %7 = vector.broadcast %6 : vector<16x1xf32> to vector<16x8xf32>
    %8 = arith.subf %3, %7 : vector<16x8xf32>
    %9 = math.exp %8 : vector<16x8xf32>
    %cst_4 = arith.constant dense<0.000000e+00> : vector<16xf32>
    %10 = vector.multi_reduction <add>, %9, %cst_4 [1] : vector<16x8xf32> to vector<16xf32>
    %11 = vector.shape_cast %10 : vector<16xf32> to vector<16x1xf32>
    %12 = math.log %11 : vector<16x1xf32>
    %13 = arith.addf %12, %6 : vector<16x1xf32>
    %14 = tpu.iota {dimensions = array<i32: 1>} : vector<16x8xi32>
    %15 = vector.broadcast %4 : vector<16x1xi32> to vector<16x8xi32>
    %16 = arith.cmpi eq, %14, %15 : vector<16x8xi32>
    %cst_5 = arith.constant 0.000000e+00 : f32
    %17 = vector.broadcast %cst_5 : f32 to vector<16x8xf32>
    %18 = arith.select %16, %3, %17 : vector<16x8xi1>, vector<16x8xf32>
    %cst_6 = arith.constant dense<0.000000e+00> : vector<16xf32>
    %19 = vector.multi_reduction <add>, %18, %cst_6 [1] : vector<16x8xf32> to vector<16xf32>
    %20 = vector.shape_cast %19 : vector<16xf32> to vector<16x1xf32>
    %cst_7 = arith.constant dense<0.000000e+00> : vector<16xf32>
    %21 = vector.multi_reduction <add>, %3, %cst_7 [1] : vector<16x8xf32> to vector<16xf32>
    %22 = vector.shape_cast %21 : vector<16xf32> to vector<16x1xf32>
    %23 = arith.subf %20, %13 : vector<16x1xf32>
    %cst_8 = arith.constant 0.000000e+00 : f32
    %24 = vector.broadcast %cst_8 : f32 to vector<16x1xf32>
    %25 = arith.subf %24, %23 : vector<16x1xf32>
    %26 = math.exp %23 : vector<16x1xf32>
    %cst_9 = arith.constant 1.000000e+00 : f32
    %27 = vector.broadcast %cst_9 : f32 to vector<16x1xf32>
    %28 = arith.subf %27, %26 : vector<16x1xf32>
    %cst_10 = arith.constant 0.000000e+00 : f32
    %29 = vector.broadcast %cst_10 : f32 to vector<16x1xf32>
    %30 = arith.maximumf %28, %29 : vector<16x1xf32>
    %cst_11 = arith.constant 1.000000e+00 : f32
    %31 = vector.broadcast %cst_11 : f32 to vector<16x1xf32>
    %32 = arith.mulf %31, %30 : vector<16x1xf32>
    %33 = arith.mulf %32, %30 : vector<16x1xf32>
    %34 = arith.subf %22, %20 : vector<16x1xf32>
    %cst_12 = arith.constant 7.000000e+00 : f32
    %35 = vector.broadcast %cst_12 : f32 to vector<16x1xf32>
    %36 = arith.mulf %35, %13 : vector<16x1xf32>
    %37 = arith.subf %34, %36 : vector<16x1xf32>
    %cst_13 = arith.constant 5.000000e-01 : f32
    %38 = vector.broadcast %cst_13 : f32 to vector<16x1xf32>
    %39 = arith.mulf %38, %33 : vector<16x1xf32>
    %cst_14 = arith.constant 4.500000e-01 : f32
    %40 = vector.broadcast %cst_14 : f32 to vector<16x1xf32>
    %41 = arith.addf %39, %40 : vector<16x1xf32>
    %42 = arith.mulf %41, %25 : vector<16x1xf32>
    %cst_15 = arith.constant 0.00714285718 : f32
    %43 = vector.broadcast %cst_15 : f32 to vector<16x1xf32>
    %44 = arith.mulf %43, %37 : vector<16x1xf32>
    %45 = arith.subf %42, %44 : vector<16x1xf32>
    %c16_i32 = arith.constant 16 : i32
    %46 = arith.muli %arg0, %c16_i32 : i32
    %47 = tpu.iota {dimensions = array<i32: 0>} : vector<16x1xi32>
    %48 = vector.broadcast %46 : i32 to vector<16x1xi32>
    %49 = arith.addi %48, %47 : vector<16x1xi32>
    %c16_i32_16 = arith.constant 16 : i32
    %50 = vector.broadcast %c16_i32_16 : i32 to vector<16x1xi32>
    %51 = arith.cmpi slt, %49, %50 : vector<16x1xi32>
    %cst_17 = arith.constant 0.000000e+00 : f32
    %52 = vector.broadcast %cst_17 : f32 to vector<16x1xf32>
    %53 = arith.select %51, %45, %52 : vector<16x1xi1>, vector<16x1xf32>
    %c0_18 = arith.constant 0 : index
    %c0_19 = arith.constant 0 : index
    %54 = vector.load %arg4[%c0_18, %c0_19] : memref<16x1xf32, #tpu.memory_space<vmem>>, vector<16x1xf32>
    %55 = arith.addf %54, %53 : vector<16x1xf32>
    %c0_20 = arith.constant 0 : index
    %c0_21 = arith.constant 0 : index
    %56 = vector.load %arg4[%c0_20, %c0_21] : memref<16x1xf32, #tpu.memory_space<vmem>>, vector<16x1xf32>
    tpu.vector_store %arg4[%c0_20, %c0_21], %55 {strides = array<i32>} : memref<16x1xf32, #tpu.memory_space<vmem>>, vector<16x1xf32>,
    %c0_i32_22 = arith.constant 0 : i32
    %57 = arith.cmpi eq, %arg0, %c0_i32_22 : i32
    %58 = arith.extui %57 : i1 to i32
    %c0_i32_23 = arith.constant 0 : i32
    %59 = arith.cmpi ne, %58, %c0_i32_23 : i32
    scf.if %59 {
      %c0_24 = arith.constant 0 : index
      %c0_25 = arith.constant 0 : index
      %60 = vector.load %arg4[%c0_24, %c0_25] : memref<16x1xf32, #tpu.memory_space<vmem>>, vector<16x1xf32>
      %cst_26 = arith.constant dense<0.000000e+00> : vector<1xf32>
      %61 = vector.multi_reduction <add>, %60, %cst_26 [0] : vector<16x1xf32> to vector<1xf32>
      %62 = vector.shape_cast %61 : vector<1xf32> to vector<1x1xf32>
      %cst_27 = arith.constant 6.250000e-02 : f32
      %63 = vector.broadcast %cst_27 : f32 to vector<1x1xf32>
      %64 = arith.mulf %62, %63 : vector<1x1xf32>
      %c0_28 = arith.constant 0 : index
      %c0_29 = arith.constant 0 : index
      %65 = vector.load %arg3[%c0_28, %c0_29] : memref<1x1xf32, #tpu.memory_space<vmem>>, vector<1x1xf32>
      tpu.vector_store %arg3[%c0_28, %c0_29], %64 {strides = array<i32>} : memref<1x1xf32, #tpu.memory_space<vmem>>, vector<1x1xf32>,
    } else {
    }
    return
  }
  func.func @transform_0(%arg0: i32) -> (i32, i32) {
    %c0_i32 = arith.constant 0 : i32
    %c0_i32_0 = arith.constant 0 : i32
    return %arg0, %c0_i32 : i32, i32
  }
  func.func @transform_1(%arg0: i32) -> (i32, i32) {
    %c0_i32 = arith.constant 0 : i32
    %c0_i32_0 = arith.constant 0 : i32
    return %arg0, %c0_i32 : i32, i32
  }
  func.func @transform_2(%arg0: i32) -> (i32, i32) {
    %c0_i32 = arith.constant 0 : i32
    %c0_i32_0 = arith.constant 0 : i32
    %c0_i32_1 = arith.constant 0 : i32
    return %c0_i32, %c0_i32_0 : i32, i32
  }
}

</mosaic_0001>

<bundles_post_ra>
// kernel: tpu_custom_call.1
= control target key start
LH: loop header
LB: loop body
LE: loop exit
PB: predicated region body
PF: predicated region fallthrough
CT: control target
= control target key end

     0   :  { %vm23_vm0 = vcmask 64512   ;;  %v190_v4 = vmov 0   ;;  %s237_s0 = inlined_call_operand.vmem [shape: f32[16,8], index: 0, kind: input, shape index: {}]   ;;  %s238_s1 = inlined_call_operand.vmem [shape: s32[16,1], index: 1, kind: input, shape index: {}]   ;;  %s239_s2 = inlined_call_operand.hbm [shape: f32[1,1], index: 2, kind: output, shape index: {}]  }
   0x1   :  { %v19_v0 = vld [vmem:[%s237_s0] sm:$0xff]  ;;  %v20_v1 = vld [vmem:[%s237_s0 + $0x8] sm:$0xff]  ;;  %154 = vset.pattern.permute.xlu1 %v190_v4  ;;  %155 = vset.pattern.permute.xlu0 %v190_v4 }
   0x2   :  { %v21_v2 = vld [vmem:[%s238_s1] sm:$0xff]  ;;  %v24_v3 = vsel %vm23_vm0, %v19_v0, -inf }
   0x3   :  { %7 = vsyncpa [#allocation4], 0  ;;  %25 = vmax.xlane.f32.xlu0 %v24_v3  ;;  %51 = vperm.xlu1 %154, %v21_v2   ;;  %v27_v5 = vsel %vm23_vm0, %v20_v1, -inf  ;;  %v22_v6 = vld [vmem:[%s238_s1 + $0x8] sm:$0xff]  ;;  %v48_v13 = vlaneseq  ;;  %v66_v25 = vsel %vm23_vm0, %v19_v0, 0.0  ;;  %v69_v26 = vsel %vm23_vm0, %v20_v1, 0.0 }
   0x4   :  { %vm16_vm3 = vcmask 7168   ;;  %v191_v27 = vmov 0.0   ;;  %s192_s0 = smov [#allocation3]   ;;  %vm135_vm4 = vcmask 0  }
   0x5   :  { %v49_v15 = vand.u32 127, %v48_v13  ;;  %17 = vst.msk [vmem:[#allocation2] sm:$0xff] %vm16_vm3, %v191_v27  ;;  %18 = vst.msk [vmem:[#allocation2 + $0x8] sm:$0xff] %vm16_vm3, %v191_v27  ;;  %s143_s1 = sshll.u32 %s192_s0, 4  ;;  %s144_s1 = int_to_ptr.vmem [resolvable:$true] %s143_s1 }
   0x6   :  { %s168_s17 = scalar_lea.vmem %s144_s1, 16  ;;  %s172_s18 = scalar_lea.vmem %s144_s1, 32 }
   0x7   :  { %28 = vmax.xlane.f32.xlu0 %v27_v5  ;;  %54 = vperm.xlu1 %154, %v22_v6   ;;  %p169_p0 = scmp.ne.s32.totalorder %s144_s1, %s168_s17  ;;  %p173_p1 = scmp.lt.s32.totalorder %s144_s1, %s144_s1 }
   0x8   :  { %p174_p2 = scmp.lt.s32.totalorder %s172_s18, %s168_s17 }
   0xa   :  { %p175_p3 = por %p174_p2, %p173_p1 }
   0xc   :  { %p176_p4 = pnand %p175_p3, %p169_p0 }
  0x7e   :  { %v52_v14 = vpop.permute.xlu1 %51 }
  0x7f   :  { %vm56_vm1 = vcmp.eq.s32.totalorder %v49_v15, %v52_v14 }
  0x80   :  { %v58_v18 = vsel %vm56_vm1, %v19_v0, 0.0 }
  0x81   :  { %v60_v20 = vsel %vm23_vm0, %v58_v18, 0.0 }
  0x82   :  { %v55_v16 = vpop.permute.xlu1 %54 }
  0x83   :  { %vm57_vm2 = vcmp.eq.s32.totalorder %v49_v15, %v55_v16 }
  0x84   :  { %v59_v22 = vsel %vm57_vm2, %v20_v1, 0.0 }
  0x85   :  { %v63_v24 = vsel %vm23_vm0, %v59_v22, 0.0 }
  0x8c   :  { %v26_v7 = vpop.xlane.xlu0 %25 }
  0x8d   :  { %v30_v8 = vsub.f32 %v19_v0, %v26_v7  ;;  %v113_v0 = vld [vmem:[#allocation2] sm:$0xff] }
  0x8f   :  { %v32_v9 = vmul.f32 1.442695, %v30_v8 }
  0x90   :  { %v29_v10 = vpop.xlane.xlu0 %28 }
  0x91   :  { %156 = vpow2.f32 %v32_v9  ;;  %v31_v11 = vsub.f32 %v20_v1, %v29_v10 }
  0x93   :  { %v34_v12 = vmul.f32 1.442695, %v31_v11 }
  0x95   :  { %158 = vpow2.f32 %v34_v12 }
  0x9e   :  { %v157_v17 = vpop.eup %156 }
  0x9f   :  { %v36_v19 = vsel %vm23_vm0, %v157_v17, 0.0 }
  0xa0   :  { %37 = vadd.xlane.f32.xlu0 %v36_v19 }
  0xa2   :  { %v159_v21 = vpop.eup %158 }
  0xa3   :  { %v39_v23 = vsel %vm23_vm0, %v159_v21, 0.0 }
  0xa4   :  { %40 = vadd.xlane.f32.xlu1 %v39_v23  ;;  %61 = vadd.xlane.f32.xlu0 %v60_v20 }
  0xa8   :  { %64 = vadd.xlane.f32.xlu0 %v63_v24 }
  0xac   :  { %67 = vadd.xlane.f32.xlu0 %v66_v25 }
  0xb0   :  { %70 = vadd.xlane.f32.xlu0 %v69_v26 }
 0x129   :  { %v38_v28 = vpop.xlane.xlu0 %37 }
 0x12a   :  { %160 = vlog2.f32 %v38_v28 }
 0x12d   :  { %v41_v29 = vpop.xlane.xlu1 %40  ;;  %v62_v32 = vpop.xlane.xlu0 %61 }
 0x12e   :  { %162 = vlog2.f32 %v41_v29 }
 0x131   :  { %v65_v39 = vpop.xlane.xlu0 %64 }
 0x135   :  { %v68_v43 = vpop.xlane.xlu0 %67 }
 0x136   :  { %v86_v47 = vsub.f32 %v68_v43, %v62_v32 }
 0x137   :  { %v161_v30 = vpop.eup %160 }
 0x138   :  { %v43_v31 = vmul.f32 0.6931472, %v161_v30 }
 0x139   :  { %v71_v51 = vpop.xlane.xlu0 %70 }
 0x13a   :  { %v46_v33 = vadd.f32 %v43_v31, %v26_v7  ;;  %v87_v59 = vsub.f32 %v71_v51, %v65_v39  ;;  %v114_v7 = vld [vmem:[#allocation2 + $0x8] sm:$0xff] }
 0x13b   :  { %v163_v34 = vpop.eup %162 }
 0x13c   :  { %v45_v35 = vmul.f32 0.6931472, %v163_v34  ;;  %v72_v36 = vsub.f32 %v62_v32, %v46_v33  ;;  %v88_v46 = vmul.f32 7.0, %v46_v33 }
 0x13e   :  { %v76_v37 = vmul.f32 1.442695, %v72_v36  ;;  %v47_v38 = vadd.f32 %v45_v35, %v29_v10  ;;  %v90_v54 = vsub.f32 %v86_v47, %v88_v46  ;;  %v74_v56 = vsub.f32 0.0, %v72_v36 }
 0x140   :  { %164 = vpow2.f32 %v76_v37  ;;  %v73_v40 = vsub.f32 %v65_v39, %v47_v38  ;;  %v89_v55 = vmul.f32 7.0, %v47_v38  ;;  %v98_v62 = vmul.f32 0.007142857, %v90_v54 }
 0x142   :  { %v78_v41 = vmul.f32 1.442695, %v73_v40  ;;  %v91_v63 = vsub.f32 %v87_v59, %v89_v55  ;;  %v75_v1 = vsub.f32 0.0, %v73_v40 }
 0x144   :  { %166 = vpow2.f32 %v78_v41  ;;  %v99_v6 = vmul.f32 0.007142857, %v91_v63 }
 0x14d   :  { %v165_v42 = vpop.eup %164 }
 0x14e   :  { %v80_v44 = vsub.f32 1.0, %v165_v42 }
 0x150   :  { %v82_v45 = vmax.f32 %v80_v44, 0.0 }
 0x151   :  { %v167_v48 = vpop.eup %166 }
 0x152   :  { %v84_v49 = vmul.f32 %v82_v45, %v82_v45  ;;  %v81_v50 = vsub.f32 1.0, %v167_v48 }
 0x154   :  { %v92_v52 = vmul.f32 0.5, %v84_v49  ;;  %v83_v53 = vmax.f32 %v81_v50, 0.0 }
 0x156   :  { %v94_v57 = vadd.f32 0.45, %v92_v52  ;;  %v85_v58 = vmul.f32 %v83_v53, %v83_v53 }
 0x158   :  { %v96_v60 = vmul.f32 %v94_v57, %v74_v56  ;;  %v93_v61 = vmul.f32 0.5, %v85_v58 }
 0x15a   :  { %v95_v2 = vadd.f32 0.45, %v93_v61  ;;  %v100_v3 = vsub.f32 %v96_v60, %v98_v62 }
 0x15c   :  { %v97_v4 = vmul.f32 %v95_v2, %v75_v1  ;;  %v115_v5 = vadd.f32 %v113_v0, %v100_v3 }
 0x15e   :  { %118 = vst.msk [vmem:[#allocation2] sm:$0xff] %vm16_vm3, %v115_v5  ;;  %v101_v8 = vsub.f32 %v97_v4, %v99_v6 }
 0x160   :  { %v116_v9 = vadd.f32 %v114_v7, %v101_v8 }
 0x162   :  { %119 = vst.msk [vmem:[#allocation2 + $0x8] sm:$0xff] %vm16_vm3, %v116_v9 }
 0x165   :  { %v123_v10 = vld [vmem:[#allocation2] sm:$0xff] }
 0x166   :  { %v125_v12 = vsel %vm16_vm3, %v123_v10, 0.0 }
 0x169   :  { %v124_v11 = vld [vmem:[#allocation2 + $0x8] sm:$0xff] }
 0x16a   :  { %v126_v13 = vsel %vm16_vm3, %v124_v11, 0.0 }
 0x16b   :  { %v127_v14 = vadd.f32 %v126_v13, %v125_v12 }
 0x16d   :  { %v128_v15 = vrot.slane %v127_v14, 4 }
 0x16f   :  { %v129_v16 = vadd.f32 %v128_v15, %v127_v14 }
 0x171   :  { %v130_v17 = vrot.slane %v129_v16, 2 }
 0x173   :  { %v131_v18 = vadd.f32 %v130_v17, %v129_v16 }
 0x175   :  { %v132_v19 = vrot.slane %v131_v18, 1 }
 0x177   :  { %v133_v20 = vadd.f32 %v132_v19, %v131_v18 }
 0x179   :  { %v134_v21 = vmul.f32 0.0625, %v133_v20 }
 0x17b   :  { %136 = vst.msk [vmem:[#allocation3] sm:$0x1] %vm135_vm4, %v134_v21 }
 0x17c   :  { %179 = shalt.err (!%p176_p4)
}
 0x17d   :  { %146 = dma.vmem_to_hbm [thread:$0]  %s144_s1, 16, %s239_s2, [#allocation4]  }
 0x17e   :  { %188 = dma.done.wait [#allocation4], 16  }
 0x17f   :  { %189 = vsyncadd [#allocation4], 4294967280 }
 0x180   :  { %150 = vsyncpa [#allocation4], 1 }

</bundles_post_ra>
